<compile_context>
chip_gen: v7x
topology: tpu7x:2x2x1
jax: 0.10.0
libtpu: 0.0.40
codegen_flags: <defaults>
</compile_context>

<pallas_src>
from functools import partial

import numpy as np
import jax
import jax.numpy as jnp
from jax.experimental import pallas as pl
from jax.experimental.pallas import tpu as pltpu


def cnn_kernel(x_ref, convm_ref, biaspack_ref, fcpack_ref, out_ref):
    # x_ref:        (TB, L)     input rows for this batch tile
    # convm_ref:    (L, L*CP)   banded conv weight: column block l holds the taps that
    #                           produce conv output position l (conv bias NOT folded here)
    # biaspack_ref: (1, CP)     conv bias; +1.0 in the ones-channel (CP-1)
    # fcpack_ref:   (CP, OP)    fc_w.T zero-padded; row CP-1 holds the fc bias
    # out_ref:      (TB, OP)    lane-dense padded logits
    TB, L = x_ref.shape
    CP = biaspack_ref.shape[1]

    # Conv1d(1, C, k=3, pad=1) over every output position as ONE 2-D MXU matmul.
    conv = jnp.dot(x_ref[...], convm_ref[...],
                   preferred_element_type=jnp.float32)          # (TB, L*CP)

    # AdaptiveMaxPool1d(1): max over the L output positions.  Each position is a
    # 128-lane-aligned slice of `conv`, so this is a short tree of vreg-wise maxima
    # (no reshape / relayout of the conv slab).
    cols = [conv[:, l * CP:(l + 1) * CP] for l in range(L)]
    while len(cols) > 1:
        nxt = [jnp.maximum(cols[i], cols[i + 1]) for i in range(0, len(cols) - 1, 2)]
        if len(cols) % 2:
            nxt.append(cols[-1])
        cols = nxt
    pooled = cols[0]                                            # (TB, CP)

    # Conv bias is constant over L and ReLU is monotone, so both commute with the max:
    # apply them to the pooled tile, not the full (TB, L, CP) slab.  The ones-channel
    # (weights 0, "bias" 1) becomes exactly 1.0 here and carries the fc bias below.
    pooled = jnp.maximum(pooled + biaspack_ref[...], 0.0)       # (TB, CP)

    # Linear(C, O): pooled[:, CP-1] == 1.0 -> fc bias folded into the matmul.
    out = jnp.dot(pooled, fcpack_ref[...],
                  preferred_element_type=jnp.float32)           # (TB, OP)
    out_ref[...] = out.astype(out_ref.dtype)


def prepare_params(conv_w, conv_b, fc_w, fc_b, input_dim, *, cp=128, op=128):
    """One-time parameter packing (hoisted out of the forward path).

    conv_w: (C, 1, 3) torch Conv1d weight; conv_b: (C,)
    fc_w:   (O, C)    torch Linear weight; fc_b:   (O,)
    Returns:
      convm    (L, L*cp): banded matrix s.t. (x @ convm)[b, l*cp + c] == conv1d output
                          (without bias) for position l, channel c, with pad=1 / k=3.
      biaspack (1, cp):   conv bias padded; element cp-1 == 1.0 (ones-channel).
      fcpack   (cp, op):  fc_w.T padded; row cp-1 holds fc_b.
    Padded channels contribute exactly 0; channel cp-1 carries the fc bias.
    """
    C = conv_w.shape[0]
    O = fc_w.shape[0]
    L = int(input_dim)
    assert C < cp, "need at least one spare padded channel for the bias trick"
    assert O <= op

    w = np.asarray(conv_w, np.float32)[:, 0, :]                 # (C, 3)

    convm = np.zeros((L, L * cp), np.float32)
    for l in range(L):                                          # conv output position
        for k in range(3):                                      # tap index
            lp = l + k - 1                                      # input position (pad=1)
            if 0 <= lp < L:
                convm[lp, l * cp:l * cp + C] = w[:, k]

    biaspack = np.zeros((1, cp), np.float32)
    biaspack[0, :C] = np.asarray(conv_b, np.float32)
    biaspack[0, cp - 1] = 1.0                                   # ones-channel

    fcpack = np.zeros((cp, op), np.float32)
    fcpack[:C, :O] = np.asarray(fc_w, np.float32).T
    fcpack[cp - 1, :O] = np.asarray(fc_b, np.float32)

    return jnp.asarray(convm), jnp.asarray(biaspack), jnp.asarray(fcpack)


def _pick_batch_tile(B):
    """Batch tile: >= 2 grid steps once B >= 16 (engage both v7x TCs via 'parallel'),
    tiles up to 256 rows so v5e/v6e (single TC) amortize per-step overhead."""
    if B < 16:
        return B
    cap = min(B // 2, 256)
    tb = (cap // 8) * 8
    while tb >= 8:
        if B % tb == 0:
            return tb
        tb -= 8
    return B


@partial(jax.jit, static_argnames=("output_dim",))
def cnn_classifier_forward(x, convm, biaspack, fcpack, *, output_dim):
    """x: (B, L) float32. Returns (B, output_dim) logits matching CNNClassifier.forward."""
    B, L = x.shape
    CP, OP = fcpack.shape

    TB = _pick_batch_tile(B)
    grid = (B // TB,)

    # Only raise the scoped-VMEM limit when the per-step working set actually gets big
    # (v5e default is 16 MiB); small shapes keep compiler defaults.
    est_vmem = 4 * (2 * TB * L + TB * L * CP + convm.size + biaspack.size
                    + fcpack.size + 2 * TB * OP)
    compiler_kwargs = dict(dimension_semantics=("parallel",))
    if est_vmem > 12 * 1024 * 1024:
        compiler_kwargs["vmem_limit_bytes"] = int(min(est_vmem + (8 << 20), 60 << 20))

    out_padded = pl.pallas_call(
        cnn_kernel,
        out_shape=jax.ShapeDtypeStruct((B, OP), jnp.float32),
        grid_spec=pl.GridSpec(
            grid=grid,
            in_specs=[
                pl.BlockSpec((TB, L), lambda i: (i, 0)),
                pl.BlockSpec(convm.shape, lambda i: (0, 0)),
                pl.BlockSpec(biaspack.shape, lambda i: (0, 0)),
                pl.BlockSpec(fcpack.shape, lambda i: (0, 0)),
            ],
            out_specs=pl.BlockSpec((TB, OP), lambda i: (i, 0)),
        ),
        compiler_params=pltpu.CompilerParams(**compiler_kwargs),
    )(x, convm, biaspack, fcpack)

    return out_padded[:, :output_dim]


def reference_forward(x, conv_w, conv_b, fc_w, fc_b):
    """Pure-JAX reference mirroring the PyTorch forward exactly."""
    B, L = x.shape
    xp = jnp.pad(x, ((0, 0), (1, 1)))                                   # (B, L+2)
    taps = jnp.stack([xp[:, k:k + L] for k in range(3)], axis=-1)       # (B, L, 3)
    conv = jnp.einsum('blk,ck->bcl', taps, conv_w[:, 0, :]) + conv_b[None, :, None]
    act = jnp.maximum(conv, 0.0)
    pooled = jnp.max(act, axis=-1)                                      # (B, C)
    return pooled @ fc_w.T + fc_b[None, :]


if __name__ == "__main__":
    B, L = 2, 16            # batch, input_dim (sequence length)
    C, O = 100, 6           # conv channels, output_dim

    key = jax.random.PRNGKey(0)
    kx, kw, kb, kfw, kfb = jax.random.split(key, 5)

    x = jax.random.normal(kx, (B, L), dtype=jnp.float32)
    conv_w = jax.random.normal(kw, (C, 1, 3), dtype=jnp.float32) * 0.1   # torch Conv1d weight shape
    conv_b = jax.random.normal(kb, (C,), dtype=jnp.float32) * 0.1
    fc_w = jax.random.normal(kfw, (O, C), dtype=jnp.float32) * 0.1       # torch Linear weight shape
    fc_b = jax.random.normal(kfb, (O,), dtype=jnp.float32) * 0.1

    # One-time parameter packing (not part of the per-call forward path).
    convm, biaspack, fcpack = prepare_params(conv_w, conv_b, fc_w, fc_b, input_dim=L)

    out = cnn_classifier_forward(x, convm, biaspack, fcpack, output_dim=O)
    out = jax.block_until_ready(out)

    ref = reference_forward(x, conv_w, conv_b, fc_w, fc_b)
    assert out.shape == (B, O), out.shape
    assert jnp.allclose(out, ref, atol=1e-4, rtol=1e-4), (out, ref)

    print("KERNEL_OK")
</pallas_src>

<mosaic_0001>
module attributes {stable_mosaic.version = 11 : i64} {
  func.func @cnn_kernel(%arg0: i32, %arg1: memref<2x16xf32, #tpu.memory_space<vmem>>, %arg2: memref<16x2048xf32, #tpu.memory_space<vmem>>, %arg3: memref<1x128xf32, #tpu.memory_space<vmem>>, %arg4: memref<128x128xf32, #tpu.memory_space<vmem>>, %arg5: memref<2x128xf32, #tpu.memory_space<vmem>>) attributes {dimension_semantics = [#tpu.dimension_semantics<parallel>], iteration_bounds = array<i64: 1>, scalar_prefetch = 0 : i64, scratch_operands = 0 : i64, tpu.core_type = #tpu.core_type<tc>, window_params = [{transform_indices = @transform_0, window_bounds = array<i64: 2, 16>}, {pipeline_mode = #tpu.pipeline_mode<synchronous>, transform_indices = @transform_1, window_bounds = array<i64: 16, 2048>}, {pipeline_mode = #tpu.pipeline_mode<synchronous>, transform_indices = @transform_2, window_bounds = array<i64: 1, 128>}, {pipeline_mode = #tpu.pipeline_mode<synchronous>, transform_indices = @transform_3, window_bounds = array<i64: 128, 128>}, {transform_indices = @transform_4, window_bounds = array<i64: 2, 128>}]} {
    %c0 = arith.constant 0 : index
    %c0_0 = arith.constant 0 : index
    %0 = vector.load %arg1[%c0, %c0_0] : memref<2x16xf32, #tpu.memory_space<vmem>>, vector<2x16xf32>
    %c0_1 = arith.constant 0 : index
    %c0_2 = arith.constant 0 : index
    %1 = vector.load %arg2[%c0_1, %c0_2] : memref<16x2048xf32, #tpu.memory_space<vmem>>, vector<16x2048xf32>
    %cst = arith.constant dense<0.000000e+00> : vector<2x2048xf32>
    %2 = tpu.matmul %0, %1, %cst {dimension_numbers = #tpu.dot_dimension_numbers<[1], [0], [0], [1], [0, 0, 1, 1], [], []>} : vector<2x16xf32>, vector<16x2048xf32>, vector<2x2048xf32> -> vector<2x2048xf32>
    %3 = vector.extract_strided_slice %2 {offsets = [0, 0], sizes = [2, 128], strides = [1, 1]} : vector<2x2048xf32> to vector<2x128xf32>
    %4 = vector.extract_strided_slice %2 {offsets = [0, 128], sizes = [2, 128], strides = [1, 1]} : vector<2x2048xf32> to vector<2x128xf32>
    %5 = vector.extract_strided_slice %2 {offsets = [0, 256], sizes = [2, 128], strides = [1, 1]} : vector<2x2048xf32> to vector<2x128xf32>
    %6 = vector.extract_strided_slice %2 {offsets = [0, 384], sizes = [2, 128], strides = [1, 1]} : vector<2x2048xf32> to vector<2x128xf32>
    %7 = vector.extract_strided_slice %2 {offsets = [0, 512], sizes = [2, 128], strides = [1, 1]} : vector<2x2048xf32> to vector<2x128xf32>
    %8 = vector.extract_strided_slice %2 {offsets = [0, 640], sizes = [2, 128], strides = [1, 1]} : vector<2x2048xf32> to vector<2x128xf32>
    %9 = vector.extract_strided_slice %2 {offsets = [0, 768], sizes = [2, 128], strides = [1, 1]} : vector<2x2048xf32> to vector<2x128xf32>
    %10 = vector.extract_strided_slice %2 {offsets = [0, 896], sizes = [2, 128], strides = [1, 1]} : vector<2x2048xf32> to vector<2x128xf32>
    %11 = vector.extract_strided_slice %2 {offsets = [0, 1024], sizes = [2, 128], strides = [1, 1]} : vector<2x2048xf32> to vector<2x128xf32>
    %12 = vector.extract_strided_slice %2 {offsets = [0, 1152], sizes = [2, 128], strides = [1, 1]} : vector<2x2048xf32> to vector<2x128xf32>
    %13 = vector.extract_strided_slice %2 {offsets = [0, 1280], sizes = [2, 128], strides = [1, 1]} : vector<2x2048xf32> to vector<2x128xf32>
    %14 = vector.extract_strided_slice %2 {offsets = [0, 1408], sizes = [2, 128], strides = [1, 1]} : vector<2x2048xf32> to vector<2x128xf32>
    %15 = vector.extract_strided_slice %2 {offsets = [0, 1536], sizes = [2, 128], strides = [1, 1]} : vector<2x2048xf32> to vector<2x128xf32>
    %16 = vector.extract_strided_slice %2 {offsets = [0, 1664], sizes = [2, 128], strides = [1, 1]} : vector<2x2048xf32> to vector<2x128xf32>
    %17 = vector.extract_strided_slice %2 {offsets = [0, 1792], sizes = [2, 128], strides = [1, 1]} : vector<2x2048xf32> to vector<2x128xf32>
    %18 = vector.extract_strided_slice %2 {offsets = [0, 1920], sizes = [2, 128], strides = [1, 1]} : vector<2x2048xf32> to vector<2x128xf32>
    %19 = arith.maximumf %3, %4 : vector<2x128xf32>
    %20 = arith.maximumf %5, %6 : vector<2x128xf32>
    %21 = arith.maximumf %7, %8 : vector<2x128xf32>
    %22 = arith.maximumf %9, %10 : vector<2x128xf32>
    %23 = arith.maximumf %11, %12 : vector<2x128xf32>
    %24 = arith.maximumf %13, %14 : vector<2x128xf32>
    %25 = arith.maximumf %15, %16 : vector<2x128xf32>
    %26 = arith.maximumf %17, %18 : vector<2x128xf32>
    %27 = arith.maximumf %19, %20 : vector<2x128xf32>
    %28 = arith.maximumf %21, %22 : vector<2x128xf32>
    %29 = arith.maximumf %23, %24 : vector<2x128xf32>
    %30 = arith.maximumf %25, %26 : vector<2x128xf32>
    %31 = arith.maximumf %27, %28 : vector<2x128xf32>
    %32 = arith.maximumf %29, %30 : vector<2x128xf32>
    %33 = arith.maximumf %31, %32 : vector<2x128xf32>
    %c0_3 = arith.constant 0 : index
    %c0_4 = arith.constant 0 : index
    %34 = vector.load %arg3[%c0_3, %c0_4] : memref<1x128xf32, #tpu.memory_space<vmem>>, vector<1x128xf32>
    %35 = vector.broadcast %34 : vector<1x128xf32> to vector<2x128xf32>
    %36 = arith.addf %33, %35 : vector<2x128xf32>
    %cst_5 = arith.constant 0.000000e+00 : f32
    %37 = vector.broadcast %cst_5 : f32 to vector<2x128xf32>
    %38 = arith.maximumf %36, %37 : vector<2x128xf32>
    %c0_6 = arith.constant 0 : index
    %c0_7 = arith.constant 0 : index
    %39 = vector.load %arg4[%c0_6, %c0_7] : memref<128x128xf32, #tpu.memory_space<vmem>>, vector<128x128xf32>
    %cst_8 = arith.constant dense<0.000000e+00> : vector<2x128xf32>
    %40 = tpu.matmul %38, %39, %cst_8 {dimension_numbers = #tpu.dot_dimension_numbers<[1], [0], [0], [1], [0, 0, 1, 1], [], []>} : vector<2x128xf32>, vector<128x128xf32>, vector<2x128xf32> -> vector<2x128xf32>
    %c0_9 = arith.constant 0 : index
    %c0_10 = arith.constant 0 : index
    %41 = vector.load %arg5[%c0_9, %c0_10] : memref<2x128xf32, #tpu.memory_space<vmem>>, vector<2x128xf32>
    tpu.vector_store %arg5[%c0_9, %c0_10], %40 {strides = array<i32>} : memref<2x128xf32, #tpu.memory_space<vmem>>, vector<2x128xf32>,
    return
  }
  func.func @transform_0(%arg0: i32) -> (i32, i32) {
    %c0_i32 = arith.constant 0 : i32
    %c0_i32_0 = arith.constant 0 : i32
    return %arg0, %c0_i32 : i32, i32
  }
  func.func @transform_1(%arg0: i32) -> (i32, i32) {
    %c0_i32 = arith.constant 0 : i32
    %c0_i32_0 = arith.constant 0 : i32
    %c0_i32_1 = arith.constant 0 : i32
    return %c0_i32, %c0_i32_0 : i32, i32
  }
  func.func @transform_2(%arg0: i32) -> (i32, i32) {
    %c0_i32 = arith.constant 0 : i32
    %c0_i32_0 = arith.constant 0 : i32
    %c0_i32_1 = arith.constant 0 : i32
    return %c0_i32, %c0_i32_0 : i32, i32
  }
  func.func @transform_3(%arg0: i32) -> (i32, i32) {
    %c0_i32 = arith.constant 0 : i32
    %c0_i32_0 = arith.constant 0 : i32
    %c0_i32_1 = arith.constant 0 : i32
    return %c0_i32, %c0_i32_0 : i32, i32
  }
  func.func @transform_4(%arg0: i32) -> (i32, i32) {
    %c0_i32 = arith.constant 0 : i32
    %c0_i32_0 = arith.constant 0 : i32
    return %arg0, %c0_i32 : i32, i32
  }
}

</mosaic_0001>

<bundles_post_ra>
// kernel: cnn_classifier_forward.1
= control target key start
LH: loop header
LB: loop body
LE: loop exit
PB: predicated region body
PF: predicated region fallthrough
CT: control target
= control target key end

     0   :  { %9 = vsyncpa [#allocation3], 0  ;;  %s1126_s0 = inlined_call_operand.hbm [shape: f32[2,16], index: 0, kind: input, shape index: {}]   ;;  %s1127_s1 = inlined_call_operand.hbm [shape: f32[16,2048], index: 1, kind: input, shape index: {}]   ;;  %s1128_s2 = inlined_call_operand.vmem [shape: f32[1,128], index: 2, kind: input, shape index: {}]   ;;  %s1129_s3 = inlined_call_operand.hbm [shape: f32[128,128], index: 3, kind: input, shape index: {}]   ;;  %s1130_s4 = inlined_call_operand.hbm [shape: f32[2,128], index: 4, kind: output, shape index: {}]  }
   0x1   :  { %10 = vsyncpa [#allocation6], 0 }
   0x2   :  { %11 = vsyncpa [#allocation4], 0  ;;  %s1010_s15 = smov [#allocation5]   ;;  %s916_s19 = scalar_lea.hbm %s1127_s1, 4096 }
   0x3   :  { %s27_s16 = sshll.u32 %s1010_s15, 4  ;;  %p917_p0 = scmp.ne.s32.totalorder %s1127_s1, %s916_s19  ;;  %s28_s16 = int_to_ptr.vmem [resolvable:$true] %s27_s16 }
   0x4   :  { %p920_p1 = scmp.lt.u32.totalorder %s916_s19, %s1127_s1 }
   0x6   :  { %p922_p2 = pnand %p920_p1, %p917_p0 }
   0x8   :  { %925 = shalt.err (!%p922_p2)
}
   0x9   :  { %s926_s24 = scalar_lea.vmem %s28_s16, 4096  ;;  %p931_p4 = scmp.lt.s32.totalorder %s28_s16, %s28_s16 }
   0xa   :  { %p927_p3 = scmp.ne.s32.totalorder %s28_s16, %s926_s24  ;;  %p932_p5 = scmp.lt.s32.totalorder %s926_s24, %s926_s24 }
   0xc   :  { %p933_p6 = por %p932_p5, %p931_p4 }
   0xe   :  { %p934_p7 = pnand %p933_p6, %p927_p3 }
  0x10   :  { %937 = shalt.err (!%p934_p7)
}
  0x11   :  { %s1011_s25 = smov 2048   ;;  %s1012_s26 = smov 128  }
  0x12   :  { %33 = dma.hbm_to_vmem [thread:$0]  %s1127_s1, 4096, %s28_s16, [#allocation6], %s1011_s25, %s1011_s25, %s1012_s26  }
  0x13   :  { %s1013_s29 = smov [#allocation2]   ;;  %s1014_s5 = smov [#allocation7]  }
  0x14   :  { %s18_s30 = sshll.u32 %s1013_s29, 4  ;;  %s41_s6 = sshll.u32 %s1014_s5, 4  ;;  %s19_s30 = int_to_ptr.vmem [resolvable:$true] %s18_s30  ;;  %s42_s6 = int_to_ptr.vmem [resolvable:$true] %s41_s6 }
  0x15   :  { %s938_s9 = scalar_lea.hbm %s1126_s0, 32 }
  0x16   :  { %p939_p8 = scmp.ne.s32.totalorder %s1126_s0, %s938_s9  ;;  %p942_p9 = scmp.lt.u32.totalorder %s938_s9, %s1126_s0 }
  0x18   :  { %p944_p10 = pnand %p942_p9, %p939_p8 }
  0x1a   :  { %947 = shalt.err (!%p944_p10)
}
  0x1b   :  { %s948_s1 = scalar_lea.vmem %s19_s30, 32  ;;  %p953_p12 = scmp.lt.s32.totalorder %s19_s30, %s19_s30 }
  0x1c   :  { %p949_p11 = scmp.ne.s32.totalorder %s19_s30, %s948_s1  ;;  %p954_p13 = scmp.lt.s32.totalorder %s948_s1, %s948_s1 }
  0x1e   :  { %p955_p0 = por %p954_p13, %p953_p12 }
  0x20   :  { %p956_p1 = pnand %p955_p0, %p949_p11 }
  0x22   :  { %959 = shalt.err (!%p956_p1)
}
  0x23   :  { %21 = dma.hbm_to_vmem [thread:$0]  %s1126_s0, 32, %s19_s30, [#allocation3]  }
  0x24   :  { %s960_s18 = scalar_lea.hbm %s1129_s3, 2048 }
  0x25   :  { %p961_p2 = scmp.ne.s32.totalorder %s1129_s3, %s960_s18  ;;  %p964_p3 = scmp.lt.u32.totalorder %s960_s18, %s1129_s3 }
  0x27   :  { %p966_p4 = pnand %p964_p3, %p961_p2 }
  0x29   :  { %969 = shalt.err (!%p966_p4)
}
  0x2a   :  { %s970_s23 = scalar_lea.vmem %s42_s6, 2048  ;;  %p975_p6 = scmp.lt.s32.totalorder %s42_s6, %s42_s6 }
  0x2b   :  { %p971_p5 = scmp.ne.s32.totalorder %s42_s6, %s970_s23  ;;  %p976_p7 = scmp.lt.s32.totalorder %s970_s23, %s970_s23 }
  0x2d   :  { %p977_p8 = por %p976_p7, %p975_p6 }
  0x2f   :  { %p978_p9 = pnand %p977_p8, %p971_p5 }
  0x31   :  { %981 = shalt.err (!%p978_p9)
}
  0x32   :  { %s1015_s0 = smov 8  }
  0x33   :  { %47 = dma.hbm_to_vmem [thread:$0]  %s1129_s3, 2048, %s42_s6, [#allocation6], %s1012_s26, %s1012_s26, %s1015_s0  }
  0x34   :  { %1004 = dma.done.wait [#allocation3], 32  }
  0x35   :  { %1005 = vsyncadd [#allocation3], 4294967264 }
  0x36   :  { %1006 = dma.done.wait [#allocation6], 6144  }
  0x37   :  { %1007 = vsyncadd [#allocation6], 4294961152  ;;  %v1016_v0 = vmov 0.0   ;;  %v59_v1 = vld [vmem:[#allocation5 + $0x8] sm:$0xff]  ;;  %v58_v3 = vld [vmem:[#allocation5] sm:$0xff]  ;;  %vm90_vm0 = vcmask 130048  }
  0x38   :  { %158 = vmatprep.mubr.f32.mxu1 %v1016_v0  ;;  %v75_v2 = vld [vmem:[#allocation5 + $0x88] sm:$0xff]  ;;  %v74_v5 = vld [vmem:[#allocation5 + $0x80] sm:$0xff]  ;;  %v61_v6 = vld [vmem:[#allocation5 + $0x18] sm:$0xff]  ;;  %v1017_v53 = vmov 0.0|0.0   ;;  %vm1018_vm1 = vmmov 0   ;;  %s1019_s27 = smov [#allocation8]  }
  0x39   :  { %v850_v4 = vpack.c.bf16 %v75_v2, %v59_v1  ;;  %v852_v7 = vpack.c.bf16 %v74_v5, %v58_v3  ;;  %v77_v8 = vld [vmem:[#allocation5 + $0x98] sm:$0xff]  ;;  %v60_v9 = vld [vmem:[#allocation5 + $0x10] sm:$0xff]  ;;  %v63_v12 = vld [vmem:[#allocation5 + $0x28] sm:$0xff]  ;;  %882 = vmatprep.subr.bf16.mxu0 %v1017_v53  ;;  %847 = vmatprep.mubr.msk.f32.mxu0 %vm1018_vm1, %v1016_v0  ;;  %s779_s28 = sshll.u32 %s1019_s27, 4  ;;  %s780_s28 = int_to_ptr.vmem [resolvable:$true] %s779_s28 }
  0x3a   :  { %v76_v10 = vld [vmem:[#allocation5 + $0x90] sm:$0xff]  ;;  %v854_v11 = vpack.c.bf16 %v77_v8, %v61_v6  ;;  %v79_v13 = vld [vmem:[#allocation5 + $0xa8] sm:$0xff]  ;;  %v1085_v14 = vld [vmem:[#allocation2] sm:$0x3]  ;;  %s982_s29 = scalar_lea.vmem %s780_s28, 32  ;;  %p987_p11 = scmp.lt.s32.totalorder %s780_s28, %s780_s28 }
  0x3b   :  { %851 = vmatprep.subr.bf16.mxu1 %v850_v4  ;;  %v856_v15 = vpack.c.bf16 %v76_v10, %v60_v9  ;;  %v858_v16 = vpack.c.bf16 %v79_v13, %v63_v12  ;;  %v62_v17 = vld [vmem:[#allocation5 + $0x20] sm:$0xff]  ;;  %v65_v19 = vld [vmem:[#allocation5 + $0x38] sm:$0xff]  ;;  %v64_v23 = vld [vmem:[#allocation5 + $0x30] sm:$0xff]  ;;  %p983_p10 = scmp.ne.s32.totalorder %s780_s28, %s982_s29  ;;  %p988_p12 = scmp.lt.s32.totalorder %s982_s29, %s982_s29 }
  0x3c   :  { %853 = vmatpush1.bf16.msra.mxu1 %v852_v7  ;;  %v78_v18 = vld [vmem:[#allocation5 + $0xa0] sm:$0xff]  ;;  %v81_v20 = vld [vmem:[#allocation5 + $0xb8] sm:$0xff]  ;;  %v80_v24 = vld [vmem:[#allocation5 + $0xb0] sm:$0xff] }
  0x3d   :  { %855 = vmatprep.subr.bf16.mxu1 %v854_v11  ;;  %v860_v21 = vpack.c.bf16 %v78_v18, %v62_v17  ;;  %v862_v22 = vpack.c.bf16 %v81_v20, %v65_v19  ;;  %v67_v25 = vld [vmem:[#allocation5 + $0x48] sm:$0xff]  ;;  %v864_v27 = vpack.c.bf16 %v80_v24, %v64_v23  ;;  %v66_v29 = vld [vmem:[#allocation5 + $0x40] sm:$0xff]  ;;  %v69_v31 = vld [vmem:[#allocation5 + $0x58] sm:$0xff]  ;;  %p989_p13 = por %p988_p12, %p987_p11 }
  0x3e   :  { %v83_v26 = vld [vmem:[#allocation5 + $0xc8] sm:$0xff]  ;;  %v82_v30 = vld [vmem:[#allocation5 + $0xc0] sm:$0xff]  ;;  %v85_v32 = vld [vmem:[#allocation5 + $0xd8] sm:$0xff] }
  0x3f   :  { %789 = vmatmul.mubr.msk.f32.vlgmr.msra.gmra.mrb[0].mxu1 %vm90_vm0, %v1085_v14  ;;  %v866_v28 = vpack.c.bf16 %v83_v26, %v67_v25  ;;  %v868_v33 = vpack.c.bf16 %v82_v30, %v66_v29  ;;  %v870_v34 = vpack.c.bf16 %v85_v32, %v69_v31  ;;  %v68_v35 = vld [vmem:[#allocation5 + $0x50] sm:$0xff]  ;;  %v71_v37 = vld [vmem:[#allocation5 + $0x68] sm:$0xff]  ;;  %v70_v41 = vld [vmem:[#allocation5 + $0x60] sm:$0xff]  ;;  %p990_p0 = pnand %p989_p13, %p983_p10 }
  0x40   :  { %857 = vmatpush1.bf16.msra.mxu1 %v856_v15  ;;  %229 = vmatprep.mubr.f32.mxu1 %v1016_v0  ;;  %v84_v36 = vld [vmem:[#allocation5 + $0xd0] sm:$0xff]  ;;  %v87_v38 = vld [vmem:[#allocation5 + $0xe8] sm:$0xff]  ;;  %v86_v42 = vld [vmem:[#allocation5 + $0xe0] sm:$0xff] }
  0x41   :  { %859 = vmatprep.subr.bf16.mxu1 %v858_v16  ;;  %v872_v39 = vpack.c.bf16 %v84_v36, %v68_v35  ;;  %v874_v40 = vpack.c.bf16 %v87_v38, %v71_v37  ;;  %v73_v43 = vld [vmem:[#allocation5 + $0x78] sm:$0xff]  ;;  %v876_v45 = vpack.c.bf16 %v86_v42, %v70_v41  ;;  %v72_v47 = vld [vmem:[#allocation5 + $0x70] sm:$0xff]  ;;  %v686_v50 = vld [vmem:[#allocation7] sm:$0xff] }
  0x42   :  { %v89_v44 = vld [vmem:[#allocation5 + $0xf8] sm:$0xff]  ;;  %v88_v48 = vld [vmem:[#allocation5 + $0xf0] sm:$0xff]  ;;  %v687_v51 = vld [vmem:[#allocation7 + $0x8] sm:$0xff] }
  0x43   :  { %790 = vmatmul.mubr.msk.f32.vlgmr.msra.gmra.mrb[2].mxu1 %vm90_vm0, %v1085_v14  ;;  %v878_v46 = vpack.c.bf16 %v89_v44, %v73_v43  ;;  %v880_v49 = vpack.c.bf16 %v88_v48, %v72_v47  ;;  %v883_v52 = vpack.c.bf16 %v687_v51, %v686_v50  ;;  %v688_v54 = vld [vmem:[#allocation7 + $0x10] sm:$0xff]  ;;  %v689_v55 = vld [vmem:[#allocation7 + $0x18] sm:$0xff]  ;;  %v690_v57 = vld [vmem:[#allocation7 + $0x20] sm:$0xff] }
  0x44   :  { %861 = vmatpush1.bf16.msra.mxu1 %v860_v21  ;;  %300 = vmatprep.mubr.f32.mxu1 %v1016_v0  ;;  %v886_v56 = vpack.c.bf16 %v689_v55, %v688_v54  ;;  %v691_v58 = vld [vmem:[#allocation7 + $0x28] sm:$0xff]  ;;  %v692_v60 = vld [vmem:[#allocation7 + $0x30] sm:$0xff]  ;;  %v693_v61 = vld [vmem:[#allocation7 + $0x38] sm:$0xff] }
  0x45   :  { %863 = vmatprep.subr.bf16.mxu1 %v862_v22  ;;  %884 = vmatpush3.bf16.msra.mxu0 %v883_v52  ;;  %v889_v59 = vpack.c.bf16 %v691_v58, %v690_v57  ;;  %v892_v62 = vpack.c.bf16 %v693_v61, %v692_v60  ;;  %v694_v63 = vld [vmem:[#allocation7 + $0x40] sm:$0xff]  ;;  %v695_v1 = vld [vmem:[#allocation7 + $0x48] sm:$0xff]  ;;  %v696_v3 = vld [vmem:[#allocation7 + $0x50] sm:$0xff] }
  0x46   :  { %885 = vmatprep.subr.bf16.mxu0 %v1017_v53  ;;  %v895_v2 = vpack.c.bf16 %v695_v1, %v694_v63  ;;  %v697_v4 = vld [vmem:[#allocation7 + $0x58] sm:$0xff]  ;;  %v698_v6 = vld [vmem:[#allocation7 + $0x60] sm:$0xff]  ;;  %v699_v7 = vld [vmem:[#allocation7 + $0x68] sm:$0xff] }
  0x47   :  { %791 = vmatmul.mubr.msk.f32.vlgmr.msra.gmra.mrb[4].mxu1 %vm90_vm0, %v1085_v14  ;;  %v898_v5 = vpack.c.bf16 %v697_v4, %v696_v3  ;;  %v901_v8 = vpack.c.bf16 %v699_v7, %v698_v6  ;;  %v700_v9 = vld [vmem:[#allocation7 + $0x70] sm:$0xff]  ;;  %v701_v10 = vld [vmem:[#allocation7 + $0x78] sm:$0xff] }
  0x48   :  { %865 = vmatpush1.bf16.msra.mxu1 %v864_v27  ;;  %371 = vmatprep.mubr.f32.mxu1 %v1016_v0  ;;  %v904_v11 = vpack.c.bf16 %v701_v10, %v700_v9  ;;  %v797_v41 = vld [vmem:[%s1128_s2] ss:$0 sm:$0xff] }
  0x49   :  { %867 = vmatprep.subr.bf16.mxu1 %v866_v28  ;;  %887 = vmatpush3.bf16.msra.mxu0 %v886_v56 }
  0x4a   :  { %888 = vmatprep.subr.bf16.mxu0 %v1017_v53 }
  0x4b   :  { %792 = vmatmul.mubr.msk.f32.vlgmr.msra.gmra.mrb[6].mxu1 %vm90_vm0, %v1085_v14 }
  0x4c   :  { %869 = vmatpush1.bf16.msra.mxu1 %v868_v33  ;;  %442 = vmatprep.mubr.f32.mxu1 %v1016_v0 }
  0x4d   :  { %871 = vmatprep.subr.bf16.mxu1 %v870_v34  ;;  %890 = vmatpush3.bf16.msra.mxu0 %v889_v59 }
  0x4e   :  { %891 = vmatprep.subr.bf16.mxu0 %v1017_v53 }
  0x4f   :  { %793 = vmatmul.mubr.msk.f32.vlgmr.msra.gmra.mrb[8].mxu1 %vm90_vm0, %v1085_v14 }
  0x50   :  { %873 = vmatpush1.bf16.msra.mxu1 %v872_v39  ;;  %513 = vmatprep.mubr.f32.mxu1 %v1016_v0 }
  0x51   :  { %875 = vmatprep.subr.bf16.mxu1 %v874_v40  ;;  %893 = vmatpush3.bf16.msra.mxu0 %v892_v62 }
  0x52   :  { %894 = vmatprep.subr.bf16.mxu0 %v1017_v53 }
  0x53   :  { %794 = vmatmul.mubr.msk.f32.vlgmr.msra.gmra.mrb[10].mxu1 %vm90_vm0, %v1085_v14 }
  0x54   :  { %877 = vmatpush1.bf16.msra.mxu1 %v876_v45  ;;  %584 = vmatprep.mubr.f32.mxu1 %v1016_v0 }
  0x55   :  { %879 = vmatprep.subr.bf16.mxu1 %v878_v46  ;;  %896 = vmatpush3.bf16.msra.mxu0 %v895_v2 }
  0x56   :  { %897 = vmatprep.subr.bf16.mxu0 %v1017_v53 }
  0x57   :  { %795 = vmatmul.mubr.msk.f32.vlgmr.msra.gmra.mrb[12].mxu1 %vm90_vm0, %v1085_v14 }
  0x58   :  { %881 = vmatpush1.bf16.msra.mxu1 %v880_v49  ;;  %655 = vmatprep.mubr.f32.mxu1 %v1016_v0 }
  0x59   :  { %899 = vmatpush3.bf16.msra.mxu0 %v898_v5 }
  0x5a   :  { %900 = vmatprep.subr.bf16.mxu0 %v1017_v53 }
  0x5b   :  { %796 = vmatmul.mubr.msk.f32.vlgmr.msra.gmra.mrb[14].mxu1 %vm90_vm0, %v1085_v14 }
  0x5d   :  { %902 = vmatpush3.bf16.msra.mxu0 %v901_v8 }
  0x5e   :  { %903 = vmatprep.subr.bf16.mxu0 %v1017_v53 }
  0x61   :  { %905 = vmatpush3.bf16.msra.mxu0 %v904_v11 }
 0x112   :  { %v160_v12 = vpop.f32.mrb[0].mxu1 }
 0x113   :  { %v162_v13 = vpop.f32.mrb[1].mxu1 }
 0x114   :  { %v662_v14 = vmax.f32 %v160_v12, %v162_v13 }
 0x116   :  { %v231_v15 = vpop.f32.mrb[2].mxu1 }
 0x117   :  { %v233_v16 = vpop.f32.mrb[3].mxu1 }
 0x118   :  { %v663_v17 = vmax.f32 %v231_v15, %v233_v16 }
 0x11a   :  { %v670_v18 = vmax.f32 %v662_v14, %v663_v17  ;;  %v302_v19 = vpop.f32.mrb[4].mxu1 }
 0x11b   :  { %v304_v20 = vpop.f32.mrb[5].mxu1 }
 0x11c   :  { %v664_v21 = vmax.f32 %v302_v19, %v304_v20 }
 0x11e   :  { %v373_v22 = vpop.f32.mrb[6].mxu1 }
 0x11f   :  { %v375_v23 = vpop.f32.mrb[7].mxu1 }
 0x120   :  { %v665_v24 = vmax.f32 %v373_v22, %v375_v23 }
 0x122   :  { %v671_v25 = vmax.f32 %v664_v21, %v665_v24  ;;  %v444_v26 = vpop.f32.mrb[8].mxu1 }
 0x123   :  { %v446_v27 = vpop.f32.mrb[9].mxu1 }
 0x124   :  { %v674_v28 = vmax.f32 %v670_v18, %v671_v25  ;;  %v666_v0 = vmax.f32 %v444_v26, %v446_v27 }
 0x126   :  { %v515_v29 = vpop.f32.mrb[10].mxu1 }
 0x127   :  { %v517_v30 = vpop.f32.mrb[11].mxu1 }
 0x128   :  { %v667_v31 = vmax.f32 %v515_v29, %v517_v30 }
 0x12a   :  { %v672_v32 = vmax.f32 %v666_v0, %v667_v31  ;;  %v586_v33 = vpop.f32.mrb[12].mxu1 }
 0x12b   :  { %v588_v34 = vpop.f32.mrb[13].mxu1 }
 0x12c   :  { %v668_v35 = vmax.f32 %v586_v33, %v588_v34 }
 0x12e   :  { %v657_v36 = vpop.f32.mrb[14].mxu1 }
 0x12f   :  { %v659_v37 = vpop.f32.mrb[15].mxu1 }
 0x130   :  { %v669_v38 = vmax.f32 %v657_v36, %v659_v37 }
 0x132   :  { %v673_v39 = vmax.f32 %v668_v35, %v669_v38 }
 0x134   :  { %v675_v40 = vmax.f32 %v672_v32, %v673_v39 }
 0x136   :  { %v676_v42 = vmax.f32 %v674_v28, %v675_v40 }
 0x138   :  { %v684_v43 = vadd.f32 %v797_v41, %v676_v42 }
 0x13a   :  { %v685_v44 = vmax.f32 %v684_v43, 0.0 }
 0x13c   :  { %848 = vmatmul.mubr.f32.vlgmr.msra.gmra.mrb[0].mxu0 %v685_v44 }
 0x20f   :  { %v768_v45 = vpop.f32.mrb[0].mxu0 }
 0x210   :  { %772 = vst [vmem:[#allocation8] sm:$0x3] %v768_v45  ;;  %v849_v46 = vpop.f32.mrb[1].mxu0 }
 0x211   :  { %993 = shalt.err (!%p990_p0)
}
 0x212   :  { %s994_s2 = scalar_lea.hbm %s1130_s4, 32 }
 0x213   :  { %p995_p1 = scmp.ne.s32.totalorder %s1130_s4, %s994_s2  ;;  %p998_p2 = scmp.lt.u32.totalorder %s994_s2, %s1130_s4 }
 0x215   :  { %p1000_p3 = pnand %p998_p2, %p995_p1 }
 0x217   :  { %1003 = shalt.err (!%p1000_p3)
}
 0x218   :  { %782 = dma.vmem_to_hbm [thread:$0]  %s780_s28, 32, %s1130_s4, [#allocation4]  }
 0x219   :  { %1008 = dma.done.wait [#allocation4], 32  }
 0x21a   :  { %1009 = vsyncadd [#allocation4], 4294967264 }
 0x21b   :  { %786 = vsyncpa [#allocation3], 1 }
 0x21c   :  { %787 = vsyncpa [#allocation6], 1 }
 0x21d   :  { %788 = vsyncpa [#allocation4], 1 }

</bundles_post_ra>
